<compile_context>
chip_gen: v6e
topology: v6e:2x2x1
jax: 0.10.0
libtpu: 0.0.40
codegen_flags: <defaults>
</compile_context>

<pallas_src>
import math

import jax
import jax.numpy as jnp
from jax.experimental import pallas as pl
from jax.experimental.pallas import tpu as pltpu


# --------------------------------------------------------------------------
# Kernels
# --------------------------------------------------------------------------
def _rmsnorm_rows_kernel(x_ref, scale_ref, o_ref):
    """Single-pass kernel: each block holds TB whole rows (row = one batch elem)."""
    x = x_ref[...]                                   # (TB, N) native dtype
    xf = x.astype(jnp.float32)
    mean_sq = jnp.mean(xf * xf, axis=-1, keepdims=True)   # (TB, 1) f32
    inv_rms = jax.lax.rsqrt(mean_sq)                       # EUP, off critical path
    if x.dtype == jnp.float32:
        out = (xf * inv_rms) * scale_ref[...].astype(jnp.float32)
    else:
        # bf16 VALU on v6e/v7x: keep the output path narrow, halve f32 temps.
        out = (x * scale_ref[...].astype(x.dtype)) * inv_rms.astype(x.dtype)
    o_ref[...] = out.astype(o_ref.dtype)


def _sumsq_kernel(x_ref, ssq_ref):
    """Two-pass fallback, pass 1: accumulate per-row sum(x^2) over column tiles."""
    @pl.when(pl.program_id(1) == 0)
    def _():
        ssq_ref[...] = jnp.zeros_like(ssq_ref)
    xf = x_ref[...].astype(jnp.float32)
    ssq_ref[...] += jnp.sum(xf * xf, axis=-1, keepdims=True)


def _normalize_kernel(inv_ref, x_ref, scale_ref, o_ref):
    """Two-pass fallback, pass 2: out = x * inv_rms * scale on (tb, tn) tiles."""
    x = x_ref[...]
    inv = inv_ref[...]                                # (tb, 1) f32
    if x.dtype == jnp.float32:
        out = (x * inv) * scale_ref[...].astype(jnp.float32)
    else:
        out = (x * scale_ref[...].astype(x.dtype)) * inv.astype(x.dtype)
    o_ref[...] = out.astype(o_ref.dtype)


# --------------------------------------------------------------------------
# Tiling heuristics
# --------------------------------------------------------------------------
def _tpu_params():
    """(slab_target_bytes, vmem_limit_bytes) per TPU generation."""
    kind = ""
    try:
        kind = jax.devices()[0].device_kind.lower()
    except Exception:
        pass
    if "v7" in kind:
        return 6 << 20, 48 << 20    # ~3.2 TB/s HBM, 64 MiB VMEM
    if "v6" in kind:
        return 3 << 20, 96 << 20    # ~1.4 TB/s HBM, 128 MiB VMEM
    if "v5" in kind:
        return 2 << 20, 96 << 20    # ~0.8 TB/s HBM, 128 MiB VMEM
    return 4 << 20, 48 << 20        # unknown: conservative VMEM, mid slab


def _row_tile_candidates(B):
    """Layout-legal row tiles: multiples of 8 dividing B, plus full B."""
    cands = [t for t in range(8, B, 8) if B % t == 0]
    cands.append(B)
    return cands


def _pick_single_pass_tile(B, N, x_itemsize, s_itemsize, slab, vmem_limit):
    """Rows per block, scored for (a) few-MiB slab, (b) >=2 (ideally >=8, even) steps."""
    row_bytes = N * x_itemsize

    def footprint(tb):
        blk = tb * row_bytes
        f32_tmp = tb * N * 4 * (2 if x_itemsize == 4 else 1)
        # 2x double-buffered in + 2x out + 2x scale + f32 compute temps
        return 4 * blk + 2 * N * s_itemsize + f32_tmp

    best, best_score = None, None
    for tb in _row_tile_candidates(B):
        if footprint(tb) > vmem_limit:
            continue
        steps = B // tb
        blk = tb * row_bytes
        score = -abs(math.log2(max(blk, 1) / slab))
        if steps < 2:
            score -= 4.0                  # grid of 1 kills the software pipeline
        elif steps < 8:
            score -= 0.5 * (8 - steps)
        if steps > 1 and steps % 2:
            score -= 0.5                  # odd grid imbalances v7x's 2 TensorCores
        if best_score is None or score > best_score:
            best, best_score = tb, score
    return best                           # None -> nothing fits -> two-pass fallback


def _pick_two_pass_tiles(Bp, N, itemsize, slab):
    """(tb, tn) for the column-tiled two-pass path; Bp is a multiple of 8."""
    elems = max(1, slab // itemsize)
    if N % 128 != 0:
        # TODO(synk): mask ragged lane tails instead of taking the full row width.
        tn = N
    else:
        m = N // 128
        k = max(1, min(m, elems // (8 * 128)))
        while k > 1 and m % k != 0:
            k -= 1
        tn = 128 * k
    max_tb = max(8, (elems // max(1, tn)) // 8 * 8)
    tb = 8
    for t in range(8, min(Bp, max_tb) + 1, 8):
        if Bp % t == 0:
            tb = t
    return tb, tn


# --------------------------------------------------------------------------
# Wrappers
# --------------------------------------------------------------------------
def _rmsnorm_two_pass(x_flat, scale_flat, out_dtype, slab, vmem_limit):
    """Column-tiled fallback: bounded-VMEM for huge S*D rows (1.5x HBM traffic)."""
    B, N = x_flat.shape
    itemsize = jnp.dtype(x_flat.dtype).itemsize

    pad = (-B) % 8                       # pad rows so tb can be sublane-aligned
    if pad:
        x_flat = jnp.pad(x_flat, ((0, pad), (0, 0)))
    Bp = B + pad

    tb, tn = _pick_two_pass_tiles(Bp, N, itemsize, slab)
    grid = (Bp // tb, max(1, N // tn))

    # Pass 1: per-row sum of squares (reduction axis last, resident accumulator).
    ssq = pl.pallas_call(
        _sumsq_kernel,
        out_shape=jax.ShapeDtypeStruct((Bp, 1), jnp.float32),
        grid_spec=pltpu.PrefetchScalarGridSpec(
            num_scalar_prefetch=0,
            grid=grid,
            in_specs=[pl.BlockSpec((tb, tn), lambda i, j: (i, j))],
            out_specs=pl.BlockSpec((tb, 1), lambda i, j: (i, 0)),
        ),
        compiler_params=pltpu.CompilerParams(
            dimension_semantics=("parallel", "arbitrary"),
            vmem_limit_bytes=vmem_limit,
        ),
    )(x_flat)

    inv_rms = jax.lax.rsqrt(ssq / float(N))            # tiny (Bp, 1) XLA op

    # Pass 2: normalize + scale over the same column tiles (fully parallel grid).
    out = pl.pallas_call(
        _normalize_kernel,
        out_shape=jax.ShapeDtypeStruct((Bp, N), out_dtype),
        grid_spec=pltpu.PrefetchScalarGridSpec(
            num_scalar_prefetch=0,
            grid=grid,
            in_specs=[
                pl.BlockSpec((tb, 1), lambda i, j: (i, 0)),
                pl.BlockSpec((tb, tn), lambda i, j: (i, j)),
                pl.BlockSpec((1, tn), lambda i, j: (0, j)),
            ],
            out_specs=pl.BlockSpec((tb, tn), lambda i, j: (i, j)),
        ),
        compiler_params=pltpu.CompilerParams(
            dimension_semantics=("parallel", "parallel"),
            vmem_limit_bytes=vmem_limit,
        ),
    )(inv_rms, x_flat, scale_flat)

    return out[:B] if pad else out


def rmsnorm(x, scale):
    """x: (B, S, D); scale: (S_max, D) with S_max >= S. Matches the torch forward."""
    B, S, D = x.shape
    N = S * D
    x_flat = x.reshape(B, N)                       # lane-dense: full row last
    scale_flat = scale[:S, :].reshape(1, N)        # native dtype; cast in kernel

    slab, vmem_limit = _tpu_params()
    x_itemsize = jnp.dtype(x.dtype).itemsize
    s_itemsize = jnp.dtype(scale.dtype).itemsize

    tb = _pick_single_pass_tile(B, N, x_itemsize, s_itemsize, slab, vmem_limit)
    use_two_pass = tb is None or (
        B // tb == 1 and tb * N * x_itemsize > 2 * slab and N % 128 == 0
    )
    if use_two_pass:
        out_flat = _rmsnorm_two_pass(x_flat, scale_flat, x.dtype, slab, vmem_limit)
        return out_flat.reshape(B, S, D)

    grid = (B // tb,)
    cost = pl.CostEstimate(
        flops=4 * B * N,
        transcendentals=B,
        bytes_accessed=2 * B * N * x_itemsize + N * s_itemsize,
    )
    # NOTE: pipeline_mode=pl.Buffered(3) on the x spec is a modest further knob on
    # v5e/v6e once blocks are few-MiB; left at the default double-buffering here.
    out_flat = pl.pallas_call(
        _rmsnorm_rows_kernel,
        out_shape=jax.ShapeDtypeStruct((B, N), x.dtype),
        grid_spec=pltpu.PrefetchScalarGridSpec(
            num_scalar_prefetch=0,
            grid=grid,
            in_specs=[
                pl.BlockSpec((tb, N), lambda i: (i, 0)),
                pl.BlockSpec((1, N), lambda i: (0, 0)),
            ],
            out_specs=pl.BlockSpec((tb, N), lambda i: (i, 0)),
        ),
        compiler_params=pltpu.CompilerParams(
            dimension_semantics=("parallel",),
            vmem_limit_bytes=vmem_limit,
        ),
        cost_estimate=cost,
    )(x_flat, scale_flat)
    return out_flat.reshape(B, S, D)


# --------------------------------------------------------------------------
# Self-test
# --------------------------------------------------------------------------
if __name__ == "__main__":
    key = jax.random.PRNGKey(0)
    k1, k2, k3 = jax.random.split(key, 3)

    # --- Test 1: module-sized config through the main (single-pass) path -----
    B, S, D = 2, 8, 32
    x = jax.random.normal(k1, (B, S, D), dtype=jnp.float32)
    scale = jnp.ones((S, D), dtype=jnp.float32)   # nn.Parameter(torch.ones(layer_shape))

    out = rmsnorm(x, scale)
    jax.block_until_ready(out)

    ff_rms = jnp.sqrt(jnp.mean(x.reshape(B, -1) ** 2, axis=-1)).reshape(B, 1, 1)
    ref = scale[None, :, :] * (x / ff_rms)
    assert jnp.allclose(out, ref, atol=1e-5, rtol=1e-5)

    # --- Test 2: force the column-tiled two-pass fallback (tiny slab) --------
    B2, S2, D2 = 16, 4, 128
    N2 = S2 * D2
    x2 = jax.random.normal(k2, (B2, S2, D2), dtype=jnp.float32)
    scale2 = 1.0 + 0.1 * jax.random.normal(k3, (S2, D2), dtype=jnp.float32)

    out2_flat = _rmsnorm_two_pass(
        x2.reshape(B2, N2),
        scale2.reshape(1, N2),
        x2.dtype,
        slab=8 * 128 * 4 * 2,                 # forces tn < N -> exercises accumulator
        vmem_limit=_tpu_params()[1],
    )
    out2 = jax.block_until_ready(out2_flat).reshape(B2, S2, D2)

    ff_rms2 = jnp.sqrt(jnp.mean(x2.reshape(B2, -1) ** 2, axis=-1)).reshape(B2, 1, 1)
    ref2 = scale2[None, :, :] * (x2 / ff_rms2)
    assert jnp.allclose(out2, ref2, atol=1e-5, rtol=1e-5)

    print("KERNEL_OK")
</pallas_src>

<mosaic_0001>
module attributes {stable_mosaic.version = 11 : i64} {
  func.func @_rmsnorm_rows_kernel(%arg0: i32, %arg1: memref<2x256xf32, #tpu.memory_space<vmem>>, %arg2: memref<1x256xf32, #tpu.memory_space<vmem>>, %arg3: memref<2x256xf32, #tpu.memory_space<vmem>>) attributes {dimension_semantics = [#tpu.dimension_semantics<parallel>], iteration_bounds = array<i64: 1>, scalar_prefetch = 0 : i64, scratch_operands = 0 : i64, tpu.core_type = #tpu.core_type<tc>, window_params = [{transform_indices = @transform_0, window_bounds = array<i64: 2, 256>}, {pipeline_mode = #tpu.pipeline_mode<synchronous>, transform_indices = @transform_1, window_bounds = array<i64: 1, 256>}, {transform_indices = @transform_2, window_bounds = array<i64: 2, 256>}]} {
    %c0 = arith.constant 0 : index
    %c0_0 = arith.constant 0 : index
    %0 = vector.load %arg1[%c0, %c0_0] : memref<2x256xf32, #tpu.memory_space<vmem>>, vector<2x256xf32>
    %1 = arith.mulf %0, %0 : vector<2x256xf32>
    %cst = arith.constant dense<0.000000e+00> : vector<2xf32>
    %2 = vector.multi_reduction <add>, %1, %cst [1] : vector<2x256xf32> to vector<2xf32>
    %3 = vector.shape_cast %2 : vector<2xf32> to vector<2x1xf32>
    %cst_1 = arith.constant 2.560000e+02 : f32
    %4 = vector.broadcast %cst_1 : f32 to vector<2x1xf32>
    %5 = arith.divf %3, %4 : vector<2x1xf32>
    %6 = math.rsqrt %5 : vector<2x1xf32>
    %7 = vector.broadcast %6 : vector<2x1xf32> to vector<2x256xf32>
    %8 = arith.mulf %0, %7 : vector<2x256xf32>
    %c0_2 = arith.constant 0 : index
    %c0_3 = arith.constant 0 : index
    %9 = vector.load %arg2[%c0_2, %c0_3] : memref<1x256xf32, #tpu.memory_space<vmem>>, vector<1x256xf32>
    %10 = vector.broadcast %9 : vector<1x256xf32> to vector<2x256xf32>
    %11 = arith.mulf %8, %10 : vector<2x256xf32>
    %c0_4 = arith.constant 0 : index
    %c0_5 = arith.constant 0 : index
    %12 = vector.load %arg3[%c0_4, %c0_5] : memref<2x256xf32, #tpu.memory_space<vmem>>, vector<2x256xf32>
    tpu.vector_store %arg3[%c0_4, %c0_5], %11 {strides = array<i32>} : memref<2x256xf32, #tpu.memory_space<vmem>>, vector<2x256xf32>,
    return
  }
  func.func @transform_0(%arg0: i32) -> (i32, i32) {
    %c0_i32 = arith.constant 0 : i32
    %c0_i32_0 = arith.constant 0 : i32
    return %arg0, %c0_i32 : i32, i32
  }
  func.func @transform_1(%arg0: i32) -> (i32, i32) {
    %c0_i32 = arith.constant 0 : i32
    %c0_i32_0 = arith.constant 0 : i32
    %c0_i32_1 = arith.constant 0 : i32
    return %c0_i32, %c0_i32_0 : i32, i32
  }
  func.func @transform_2(%arg0: i32) -> (i32, i32) {
    %c0_i32 = arith.constant 0 : i32
    %c0_i32_0 = arith.constant 0 : i32
    return %arg0, %c0_i32 : i32, i32
  }
}

</mosaic_0001>

<bundles_post_ra>
// kernel: tpu_custom_call.1
= control target key start
LH: loop header
LB: loop body
LE: loop exit
PB: predicated region body
PF: predicated region fallthrough
CT: control target
= control target key end

     0   :  { %7 = vsyncpa [#allocation3], 0  ;;  %s207_s0 = inlined_call_operand.hbm [shape: f32[2,256], index: 0, kind: input, shape index: {}]   ;;  %s208_s1 = inlined_call_operand.hbm [shape: f32[1,256], index: 1, kind: input, shape index: {}]   ;;  %s209_s2 = inlined_call_operand.hbm [shape: f32[2,256], index: 2, kind: output, shape index: {}]  }
   0x1   :  { %8 = vsyncpa [#allocation6], 0 }
   0x2   :  { %9 = vsyncpa [#allocation4], 0  ;;  %s178_s9 = smov [#allocation2]   ;;  %s179_s11 = smov [#allocation5]  }
   0x3   :  { %s16_s10 = sshll.u32 %s178_s9, 4  ;;  %s26_s12 = sshll.u32 %s179_s11, 4  ;;  %s17_s10 = int_to_ptr.vmem [resolvable:$true] %s16_s10  ;;  %s27_s12 = int_to_ptr.vmem [resolvable:$true] %s26_s12 }
   0x4   :  { %s120_s13 = scalar_lea.vmem %s17_s10, 64  ;;  %p125_p1 = scmp.lt.s32.totalorder %s17_s10, %s17_s10 }
   0x5   :  { %p121_p0 = scmp.ne.s32.totalorder %s17_s10, %s120_s13  ;;  %p126_p2 = scmp.lt.s32.totalorder %s120_s13, %s120_s13 }
   0x7   :  { %p127_p3 = por %p126_p2, %p125_p1 }
   0x9   :  { %p128_p4 = pnand %p127_p3, %p121_p0 }
   0xb   :  { %131 = shalt.err (!%p128_p4)
}
   0xc   :  { %19 = dma.hbm_to_vmem [thread:$0]  %s207_s0, 64, %s17_s10, [#allocation3]  }
   0xd   :  { %s140_s16 = scalar_lea.vmem %s27_s12, 32  ;;  %p145_p6 = scmp.lt.s32.totalorder %s27_s12, %s27_s12 }
   0xe   :  { %p141_p5 = scmp.ne.s32.totalorder %s27_s12, %s140_s16  ;;  %p146_p7 = scmp.lt.s32.totalorder %s140_s16, %s140_s16 }
  0x10   :  { %p147_p8 = por %p146_p7, %p145_p6 }
  0x12   :  { %p148_p9 = pnand %p147_p8, %p141_p5 }
  0x14   :  { %151 = shalt.err (!%p148_p9)
}
  0x15   :  { %29 = dma.hbm_to_vmem [thread:$0]  %s208_s1, 32, %s27_s12, [#allocation6]  }
  0x16   :  { %172 = dma.done.wait [#allocation3], 64  }
  0x17   :  { %173 = vsyncadd [#allocation3], 4294967232 }
  0x18   :  { %174 = dma.done.wait [#allocation6], 32  }
  0x19   :  { %175 = vsyncadd [#allocation6], 4294967264  ;;  %v42_v0 = vlaneseq  ;;  %v180_v1 = vmov 1983009808   ;;  %v36_v6 = vld [vmem:[#allocation2] sm:$0xf] }
  0x1a   :  { %v40_v2 = vunpack.c.l.s4 %v180_v1  ;;  %v37_v7 = vmul.f32 %v36_v6, %v36_v6  ;;  %vm49_vm0 = vcmask 1041408   ;;  %v68_v15 = vld [vmem:[#allocation5] sm:$0x3]  ;;  %v181_v22 = vmov 269488144   ;;  %s182_s0 = smov [#allocation7]  }
  0x1b   :  { %v43_v3 = vshrl.u32 %v42_v0, 7  ;;  %v60_v23 = vunpack.c.l.s4 %v181_v22  ;;  %s95_s1 = sshll.u32 %s182_s0, 4  ;;  %s96_s1 = int_to_ptr.vmem [resolvable:$true] %s95_s1 }
  0x1c   :  { %v41_v4 = vunpack.c.0.s8 %v40_v2  ;;  %s152_s19 = scalar_lea.vmem %s96_s1, 64  ;;  %p157_p11 = scmp.lt.s32.totalorder %s96_s1, %s96_s1 }
  0x1d   :  { %v72_v13 = vsub.s32 0, %v43_v3  ;;  %v76_v14 = vsub.s32 1, %v43_v3  ;;  %v61_v24 = vunpack.c.0.s8 %v60_v23  ;;  %p153_p10 = scmp.ne.s32.totalorder %s96_s1, %s152_s19  ;;  %p158_p12 = scmp.lt.s32.totalorder %s152_s19, %s152_s19 }
  0x1e   :  { %v44_v5 = vsub.s32 %v41_v4, %v43_v3 }
  0x1f   :  { %v73_v16 = vrot.slane %v68_v15, %v72_v13  ;;  %v77_v17 = vrot.slane %v68_v15, %v76_v14  ;;  %v64_v25 = vsub.s32 %v61_v24, %v43_v3  ;;  %p159_p13 = por %p158_p12, %p157_p11 }
  0x20   :  { %v45_v8 = vrot.slane %v37_v7, %v44_v5 }
  0x21   :  { %v78_v18 = vcombine.low %v73_v16, %v77_v17  ;;  %p160_p0 = pnand %p159_p13, %p153_p10 }
  0x22   :  { %v46_v9 = vcombine.high %v45_v8, %v45_v8  ;;  %v50_v10 = vsel %vm49_vm0, %v45_v8, 0.0 }
  0x23   :  { %v85_v19 = vrot.slane %v78_v18, %v44_v5 }
  0x24   :  { %v51_v11 = vsel %vm49_vm0, %v46_v9, 0.0 }
  0x25   :  { %v52_v12 = vadd.f32 %v51_v11, %v50_v10 }
  0x27   :  { %53 = vadd.xlane.f32.xlu0 %v52_v12 }
  0xb0   :  { %v54_v20 = vpop.xlane.xlu0 %53 }
  0xb1   :  { %v56_v21 = vmul.f32 0.00390625, %v54_v20 }
  0xb3   :  { %110 = vrsqrt.f32 %v56_v21 }
  0xc0   :  { %v111_v26 = vpop.eup %110 }
  0xc1   :  { %v65_v27 = vrot.slane %v111_v26, %v64_v25 }
  0xc3   :  { %v67_v28 = vmul.f32 %v65_v27, %v36_v6 }
  0xc5   :  { %v87_v29 = vmul.f32 %v85_v19, %v67_v28 }
  0xc7   :  { %88 = vst [vmem:[#allocation7] sm:$0xf] %v87_v29 }
  0xc8   :  { %163 = shalt.err (!%p160_p0)
}
  0xc9   :  { %98 = dma.vmem_to_hbm [thread:$0]  %s96_s1, 64, %s209_s2, [#allocation4]  }
  0xca   :  { %176 = dma.done.wait [#allocation4], 64  }
  0xcb   :  { %177 = vsyncadd [#allocation4], 4294967232 }
  0xcc   :  { %102 = vsyncpa [#allocation3], 1 }
  0xcd   :  { %103 = vsyncpa [#allocation6], 1 }
  0xce   :  { %104 = vsyncpa [#allocation4], 1 }

</bundles_post_ra>
